<compile_context>
chip_gen: v7x
topology: tpu7x:2x2x1
jax: 0.10.0
libtpu: 0.0.40
codegen_flags: <defaults>
</compile_context>

<pallas_src>
import jax
import jax.numpy as jnp
from jax.experimental import pallas as pl
from jax.experimental.pallas import tpu as pltpu


def _channelwise_rgb_kernel(rgb_ref, depth_ref, mask_ref,
                            w_enc_rgb_ref, w_enc_dep_ref, beta_ref, w_dec_ref,
                            out_ref):
    # Blocks are channels-on-sublanes / spatial-on-lanes:
    #   rgb_ref   : (3, T) f32      mask_ref, depth_ref : (1, T) f32
    #   w_enc_rgb : (256, 3) bf16   (gamma already folded in)
    #   w_enc_dep : (256, 1) f32    beta : (256, 1) f32
    #   w_dec     : (1, 256) bf16   out  : (1, T) f32
    inv = 1.0 - mask_ref[...]                                   # (1, T)
    rgb_m = (inv * rgb_ref[...]).astype(jnp.bfloat16)           # (3, T)
    depth_m = inv * depth_ref[...]                              # (1, T)

    # Encoder 1x1 conv (4 -> 256): rgb part on the MXU (K=3, bf16 operands,
    # f32 accumulate); depth part (K=1) as a VPU broadcast-FMA.
    h = jnp.dot(w_enc_rgb_ref[...], rgb_m,
                preferred_element_type=jnp.float32)             # (256, T)
    h = h + w_enc_dep_ref[...] * depth_m                        # (256,1)*(1,T)
    # BatchNorm affine: gamma folded into weights above; beta add (zeros at
    # init, kept for generality) + ReLU.
    h = jnp.maximum(h + beta_ref[...], 0.0)

    # Decoder 1x1 conv (256 -> 1): well-shaped contraction K=256, N=T.
    out_ref[...] = jnp.dot(w_dec_ref[...], h.astype(jnp.bfloat16),
                           preferred_element_type=jnp.float32
                           ).astype(out_ref.dtype)              # (1, T)


def channelwise_rgb_forward(rgb, depth, mask, w_enc, gamma, beta, w_dec,
                            *, max_tile=2048):
    """rgb: (B,3,H,W), depth: (B,1,H,W), mask: (B,1,H,W)  -> (B,1,H,W)."""
    B, _, H, W = rgb.shape
    S = H * W

    # Lane-dense spatial tile, capped by max_tile; pad spatial if needed.
    tile = min(max_tile, pl.cdiv(S, 128) * 128)
    S_pad = pl.cdiv(S, tile) * tile

    # Free metadata reshapes (NCHW is contiguous in (B, C, H*W)); no transposes.
    rgb_r = rgb.reshape(B, 3, S)
    depth_r = depth.reshape(B, 1, S)
    mask_r = mask.reshape(B, 1, S)
    if S_pad != S:
        pad = ((0, 0), (0, 0), (0, S_pad - S))
        rgb_r = jnp.pad(rgb_r, pad)
        depth_r = jnp.pad(depth_r, pad)
        mask_r = jnp.pad(mask_r, pad)

    # Fold BN gamma into the encoder conv weight; split rgb/depth input rows
    # (torch.cat puts rgb in channels 0:3, depth in channel 3). Weights are
    # tiny, so these host-side transposes are negligible.
    w_enc_g = w_enc * gamma[None, :]                         # (4, 256)
    w_enc_rgb_t = w_enc_g[:3].T.astype(jnp.bfloat16)         # (256, 3)
    w_enc_dep_t = w_enc_g[3:].T.astype(jnp.float32)          # (256, 1)
    beta_col = beta.reshape(-1, 1).astype(jnp.float32)       # (256, 1)
    w_dec_t = w_dec.T.astype(jnp.bfloat16)                   # (1, 256)

    out_rows = pl.pallas_call(
        _channelwise_rgb_kernel,
        out_shape=jax.ShapeDtypeStruct((B, 1, S_pad), jnp.float32),
        grid_spec=pltpu.PrefetchScalarGridSpec(
            num_scalar_prefetch=0,
            grid=(B, S_pad // tile),
            in_specs=[
                pl.BlockSpec((pl.Squeezed(), 3, tile), lambda b, s: (b, 0, s)),
                pl.BlockSpec((pl.Squeezed(), 1, tile), lambda b, s: (b, 0, s)),
                pl.BlockSpec((pl.Squeezed(), 1, tile), lambda b, s: (b, 0, s)),
                pl.BlockSpec((256, 3), lambda b, s: (0, 0)),   # enc weight (rgb)
                pl.BlockSpec((256, 1), lambda b, s: (0, 0)),   # enc weight (depth)
                pl.BlockSpec((256, 1), lambda b, s: (0, 0)),   # BN beta
                pl.BlockSpec((1, 256), lambda b, s: (0, 0)),   # dec weight
            ],
            out_specs=pl.BlockSpec((pl.Squeezed(), 1, tile),
                                   lambda b, s: (b, 0, s)),
        ),
        compiler_params=pltpu.CompilerParams(
            # No reduction axes: both grid dims shard across TensorCores.
            dimension_semantics=("parallel", "parallel")),
    )(rgb_r, depth_r, mask_r, w_enc_rgb_t, w_enc_dep_t, beta_col, w_dec_t)

    if S_pad != S:
        out_rows = out_rows[:, :, :S]
    return out_rows.reshape(B, 1, H, W)


def init_params(key):
    k_enc, k_dec = jax.random.split(key, 2)
    # Kaiming-normal, mode='fan_out', nonlinearity='relu': std = sqrt(2 / fan_out)
    # Encoder 1x1 conv: (out=256, in=4, 1, 1) -> fan_out = 256
    w_enc = jax.random.normal(k_enc, (4, 256), jnp.float32) * jnp.sqrt(2.0 / 256.0)
    # Decoder 1x1 conv: (out=1, in=256, 1, 1) -> fan_out = 1
    w_dec = jax.random.normal(k_dec, (256, 1), jnp.float32) * jnp.sqrt(2.0 / 1.0)
    # BatchNorm2d: weight = 1, bias = 0 (per _init_params)
    gamma = jnp.ones((256,), jnp.float32)
    beta = jnp.zeros((256,), jnp.float32)
    return w_enc, gamma, beta, w_dec


def reference_forward(rgb, depth, mask, w_enc, gamma, beta, w_dec):
    """Plain-JAX f32 reference for correctness check."""
    inv = 1.0 - mask
    x = jnp.concatenate([inv * rgb, inv * depth], axis=1)          # (B,4,H,W)
    x = jnp.transpose(x, (0, 2, 3, 1))                             # NHWC
    h = jnp.maximum(x @ w_enc * gamma + beta, 0.0)
    y = h @ w_dec                                                  # (B,H,W,1)
    return jnp.transpose(y, (0, 3, 1, 2))


if __name__ == "__main__":
    key = jax.random.PRNGKey(0)
    k_rgb, k_depth, k_mask, k_params = jax.random.split(key, 4)

    B, H, W = 2, 16, 16
    rgb = jax.random.normal(k_rgb, (B, 3, H, W), jnp.float32)
    depth = jax.random.normal(k_depth, (B, 1, H, W), jnp.float32)
    mask = (jax.random.uniform(k_mask, (B, 1, H, W)) > 0.5).astype(jnp.float32)

    w_enc, gamma, beta, w_dec = init_params(k_params)

    out = channelwise_rgb_forward(rgb, depth, mask, w_enc, gamma, beta, w_dec)
    out = jax.block_until_ready(out)

    ref = reference_forward(rgb, depth, mask, w_enc, gamma, beta, w_dec)
    assert out.shape == (B, 1, H, W)
    # bf16 MXU operands (f32 accumulate) vs f32 reference -> bf16-level tolerance.
    assert jnp.allclose(out, ref, atol=1e-1, rtol=1e-1), \
        float(jnp.max(jnp.abs(out - ref)))

    print("KERNEL_OK")
</pallas_src>

<mosaic_0001>
module attributes {stable_mosaic.version = 11 : i64} {
  func.func @_channelwise_rgb_kernel(%arg0: i32, %arg1: i32, %arg2: memref<1x3x256xf32, #tpu.memory_space<vmem>>, %arg3: memref<1x1x256xf32, #tpu.memory_space<vmem>>, %arg4: memref<1x1x256xf32, #tpu.memory_space<vmem>>, %arg5: memref<256x3xbf16, #tpu.memory_space<vmem>>, %arg6: memref<256x1xf32, #tpu.memory_space<vmem>>, %arg7: memref<256x1xf32, #tpu.memory_space<vmem>>, %arg8: memref<1x256xbf16, #tpu.memory_space<vmem>>, %arg9: memref<1x1x256xf32, #tpu.memory_space<vmem>>) attributes {dimension_semantics = [#tpu.dimension_semantics<parallel>, #tpu.dimension_semantics<parallel>], iteration_bounds = array<i64: 2, 1>, scalar_prefetch = 0 : i64, scratch_operands = 0 : i64, tpu.core_type = #tpu.core_type<tc>, window_params = [{transform_indices = @transform_0, window_bounds = array<i64: 1, 3, 256>}, {transform_indices = @transform_1, window_bounds = array<i64: 1, 1, 256>}, {transform_indices = @transform_2, window_bounds = array<i64: 1, 1, 256>}, {pipeline_mode = #tpu.pipeline_mode<synchronous>, transform_indices = @transform_3, window_bounds = array<i64: 256, 3>}, {pipeline_mode = #tpu.pipeline_mode<synchronous>, transform_indices = @transform_4, window_bounds = array<i64: 256, 1>}, {pipeline_mode = #tpu.pipeline_mode<synchronous>, transform_indices = @transform_5, window_bounds = array<i64: 256, 1>}, {pipeline_mode = #tpu.pipeline_mode<synchronous>, transform_indices = @transform_6, window_bounds = array<i64: 1, 256>}, {transform_indices = @transform_7, window_bounds = array<i64: 1, 1, 256>}]} {
    %c0 = arith.constant 0 : index
    %c0_0 = arith.constant 0 : index
    %c0_1 = arith.constant 0 : index
    %0 = vector.load %arg4[%c0, %c0_0, %c0_1] : memref<1x1x256xf32, #tpu.memory_space<vmem>>, vector<1x1x256xf32>
    %1 = vector.shape_cast %0 : vector<1x1x256xf32> to vector<1x256xf32>
    %cst = arith.constant 1.000000e+00 : f32
    %2 = vector.broadcast %cst : f32 to vector<1x256xf32>
    %3 = arith.subf %2, %1 : vector<1x256xf32>
    %c0_2 = arith.constant 0 : index
    %c0_3 = arith.constant 0 : index
    %c0_4 = arith.constant 0 : index
    %4 = vector.load %arg2[%c0_2, %c0_3, %c0_4] : memref<1x3x256xf32, #tpu.memory_space<vmem>>, vector<1x3x256xf32>
    %5 = vector.shape_cast %4 : vector<1x3x256xf32> to vector<3x256xf32>
    %6 = vector.broadcast %3 : vector<1x256xf32> to vector<3x256xf32>
    %7 = arith.mulf %6, %5 : vector<3x256xf32>
    %8 = arith.truncf %7 : vector<3x256xf32> to vector<3x256xbf16>
    %c0_5 = arith.constant 0 : index
    %c0_6 = arith.constant 0 : index
    %c0_7 = arith.constant 0 : index
    %9 = vector.load %arg3[%c0_5, %c0_6, %c0_7] : memref<1x1x256xf32, #tpu.memory_space<vmem>>, vector<1x1x256xf32>
    %10 = vector.shape_cast %9 : vector<1x1x256xf32> to vector<1x256xf32>
    %11 = arith.mulf %3, %10 : vector<1x256xf32>
    %c0_8 = arith.constant 0 : index
    %c0_9 = arith.constant 0 : index
    %12 = vector.load %arg5[%c0_8, %c0_9] : memref<256x3xbf16, #tpu.memory_space<vmem>>, vector<256x3xbf16>
    %cst_10 = arith.constant dense<0.000000e+00> : vector<256x256xf32>
    %13 = tpu.matmul %12, %8, %cst_10 {dimension_numbers = #tpu.dot_dimension_numbers<[1], [0], [0], [1], [0, 0, 1, 1], [], []>} : vector<256x3xbf16>, vector<3x256xbf16>, vector<256x256xf32> -> vector<256x256xf32>
    %c0_11 = arith.constant 0 : index
    %c0_12 = arith.constant 0 : index
    %14 = vector.load %arg6[%c0_11, %c0_12] : memref<256x1xf32, #tpu.memory_space<vmem>>, vector<256x1xf32>
    %15 = vector.broadcast %14 : vector<256x1xf32> to vector<256x256xf32>
    %16 = vector.broadcast %11 : vector<1x256xf32> to vector<256x256xf32>
    %17 = arith.mulf %15, %16 : vector<256x256xf32>
    %18 = arith.addf %13, %17 : vector<256x256xf32>
    %c0_13 = arith.constant 0 : index
    %c0_14 = arith.constant 0 : index
    %19 = vector.load %arg7[%c0_13, %c0_14] : memref<256x1xf32, #tpu.memory_space<vmem>>, vector<256x1xf32>
    %20 = vector.broadcast %19 : vector<256x1xf32> to vector<256x256xf32>
    %21 = arith.addf %18, %20 : vector<256x256xf32>
    %cst_15 = arith.constant 0.000000e+00 : f32
    %22 = vector.broadcast %cst_15 : f32 to vector<256x256xf32>
    %23 = arith.maximumf %21, %22 : vector<256x256xf32>
    %c0_16 = arith.constant 0 : index
    %c0_17 = arith.constant 0 : index
    %24 = vector.load %arg8[%c0_16, %c0_17] : memref<1x256xbf16, #tpu.memory_space<vmem>>, vector<1x256xbf16>
    %25 = arith.truncf %23 : vector<256x256xf32> to vector<256x256xbf16>
    %cst_18 = arith.constant dense<0.000000e+00> : vector<1x256xf32>
    %26 = tpu.matmul %24, %25, %cst_18 {dimension_numbers = #tpu.dot_dimension_numbers<[1], [0], [0], [1], [0, 0, 1, 1], [], []>} : vector<1x256xbf16>, vector<256x256xbf16>, vector<1x256xf32> -> vector<1x256xf32>
    %c0_19 = arith.constant 0 : index
    %c0_20 = arith.constant 0 : index
    %c0_21 = arith.constant 0 : index
    %27 = vector.load %arg9[%c0_19, %c0_20, %c0_21] : memref<1x1x256xf32, #tpu.memory_space<vmem>>, vector<1x1x256xf32>
    %28 = vector.shape_cast %27 : vector<1x1x256xf32> to vector<1x256xf32>
    %29 = vector.shape_cast %26 : vector<1x256xf32> to vector<1x1x256xf32>
    tpu.vector_store %arg9[%c0_19, %c0_20, %c0_21], %29 {strides = array<i32>} : memref<1x1x256xf32, #tpu.memory_space<vmem>>, vector<1x1x256xf32>,
    return
  }
  func.func @transform_0(%arg0: i32, %arg1: i32) -> (i32, i32, i32) {
    %c0_i32 = arith.constant 0 : i32
    %c0_i32_0 = arith.constant 0 : i32
    return %arg0, %c0_i32, %arg1 : i32, i32, i32
  }
  func.func @transform_1(%arg0: i32, %arg1: i32) -> (i32, i32, i32) {
    %c0_i32 = arith.constant 0 : i32
    %c0_i32_0 = arith.constant 0 : i32
    return %arg0, %c0_i32, %arg1 : i32, i32, i32
  }
  func.func @transform_2(%arg0: i32, %arg1: i32) -> (i32, i32, i32) {
    %c0_i32 = arith.constant 0 : i32
    %c0_i32_0 = arith.constant 0 : i32
    return %arg0, %c0_i32, %arg1 : i32, i32, i32
  }
  func.func @transform_3(%arg0: i32, %arg1: i32) -> (i32, i32) {
    %c0_i32 = arith.constant 0 : i32
    %c0_i32_0 = arith.constant 0 : i32
    %c0_i32_1 = arith.constant 0 : i32
    return %c0_i32, %c0_i32_0 : i32, i32
  }
  func.func @transform_4(%arg0: i32, %arg1: i32) -> (i32, i32) {
    %c0_i32 = arith.constant 0 : i32
    %c0_i32_0 = arith.constant 0 : i32
    %c0_i32_1 = arith.constant 0 : i32
    return %c0_i32, %c0_i32_0 : i32, i32
  }
  func.func @transform_5(%arg0: i32, %arg1: i32) -> (i32, i32) {
    %c0_i32 = arith.constant 0 : i32
    %c0_i32_0 = arith.constant 0 : i32
    %c0_i32_1 = arith.constant 0 : i32
    return %c0_i32, %c0_i32_0 : i32, i32
  }
  func.func @transform_6(%arg0: i32, %arg1: i32) -> (i32, i32) {
    %c0_i32 = arith.constant 0 : i32
    %c0_i32_0 = arith.constant 0 : i32
    %c0_i32_1 = arith.constant 0 : i32
    return %c0_i32, %c0_i32_0 : i32, i32
  }
  func.func @transform_7(%arg0: i32, %arg1: i32) -> (i32, i32, i32) {
    %c0_i32 = arith.constant 0 : i32
    %c0_i32_0 = arith.constant 0 : i32
    return %arg0, %c0_i32, %arg1 : i32, i32, i32
  }
}

</mosaic_0001>

<bundles_post_ra>
// kernel: tpu_custom_call.1
= control target key start
LH: loop header
LB: loop body
LE: loop exit
PB: predicated region body
PF: predicated region fallthrough
CT: control target
= control target key end

     0   :  { %12 = vsyncpa [#allocation3], 0  ;;  %s2491_s0 = inlined_call_operand.vmem [shape: f32[2,3,256], index: 0, kind: input, shape index: {}]   ;;  %s2492_s1 = inlined_call_operand.vmem [shape: f32[2,1,256], index: 1, kind: input, shape index: {}]   ;;  %s2493_s2 = inlined_call_operand.vmem [shape: f32[2,1,256], index: 2, kind: input, shape index: {}]   ;;  %s2494_s3 = inlined_call_operand.vmem [shape: bf16[256,3], index: 3, kind: input, shape index: {}]   ;;  %s2495_s4 = inlined_call_operand.vmem [shape: f32[256,1], index: 4, kind: input, shape index: {}]   ;;  %s2496_s5 = inlined_call_operand.vmem [shape: f32[256,1], index: 5, kind: input, shape index: {}]   ;;  %s2497_s6 = inlined_call_operand.vmem [shape: bf16[1,256], index: 6, kind: input, shape index: {}]   ;;  %s2498_s7 = inlined_call_operand.hbm [shape: f32[2,1,256], index: 7, kind: output, shape index: {}]  }
   0x1   :  { %14 = vsyncpa [#allocation3 + $0x1], 0  ;;  %s1845_s24 = smov 0   ;;  %s1847_s25 = smov 0  }
   0x2   :  { %s1849_s26 = smov 0   ;;  %s1851_s27 = smov 0  }
   0x3   :  { %s1853_s28 = smov 0   ;;  %s1855_s29 = smov 0  }
   0x4 LB: > { %s1594_s30 = sadd.s32 4294967295, %s1799_s29   ;;  %s1595_s8 = sadd.s32 4294967294, %s1799_s29   ;;  %s1799_s29 = sphi %s1855_s29, %s20_s29   ;;  %s1795_s28 = sphi %s1853_s28, %s2508_s28   ;;  %s1791_s27 = sphi %s1851_s27, %s2507_s27   ;;  %s1787_s26 = sphi %s1849_s26, %s2506_s26   ;;  %s1783_s25 = sphi %s1847_s25, %s2505_s25   ;;  %s1779_s24 = sphi %s1845_s24, %s2504_s24  }
   0x5   : > { %s32_s9 = sadd.s32 1, %s1795_s28  ;;  %s209_s10 = sadd.s32 1, %s1787_s26 }
   0x6   : > { %p34_p0 = scmp.ge.s32.totalorder %s32_s9, 2  ;;  %p219_p1 = scmp.ne.s32.totalorder %s1787_s26, %s1783_s25 }
   0x7   : > { %p220_p2 = scmp.eq.s32.totalorder %s1594_s30, 1  ;;  %p225_p3 = scmp.ne.s32.totalorder %s1783_s25, %s1779_s24 }
   0x8   : > { %s2510_s9 = smov (%p34_p0, %s32_s9), 0  ;;  %p226_p5 = scmp.eq.s32.totalorder %s1595_s8, 1 }
   0x9   : > { %2500 = sst [smem:[#allocation5_spill]] %s2510_s9  ;;  %p1885_p4 = por %p220_p2, %p219_p1 }
   0xa   : > { %s204_s12 = ssub.s32 %s1795_s28, %s2510_s9  ;;  %p1598_p6 = scmp.ge.s32.totalorder %s1799_s29, 1 }
   0xb   : > { %p207_p7 = scmp.eq.s32.totalorder %s204_s12, 0  ;;  %p1892_p8 = por %p226_p5, %p225_p3 }
   0xc   : > { %p293_p9 = scmp.lt.s32.totalorder %s1799_s29, 3 }
   0xd   : > { %s1898_s14 = scalar_select %p207_p7, %s1787_s26, %s209_s10  }
   0xe   : > { %p294_p10 = pnand %p1598_p6, %p293_p9 }
   0xf   : > { %v432_v0 = vld [vmem:[%s2495_s4 + $0x10] sm:$0xff] (!%p294_p10)  ;;  %v430_v1 = vld [vmem:[%s2495_s4] sm:$0xff] (!%p294_p10)  ;;  %p346_p11 = scmp.lt.s32.totalorder (!%p294_p10), %s1791_s27, 1  ;;  %v379_v2 = vlaneseq (!%p294_p10)  ;;  %v1801_v3 = vmov (!%p294_p10), 0   ;;  %v433_v4 = vld [vmem:[%s2495_s4 + $0x18] sm:$0xff] (!%p294_p10)  ;;  %vm826_vm0 = vcmask (!%p294_p10), 1040384  }
  0x10   : > { %297 = sbr.rel (%p294_p10) target bundleno = 623 (0x26f), region = 48  ;;  %1703 = vset.pattern.permute.xlu1 (!%p294_p10), %v1801_v3  ;;  %1702 = vset.pattern.permute.xlu0 (!%p294_p10), %v1801_v3  ;;  %v431_v6 = vld [vmem:[%s2495_s4 + $0x8] sm:$0xff] (!%p294_p10)  ;;  %v1029_v8 = vld [vmem:[%s2496_s5] sm:$0xff] (!%p294_p10)  ;;  %vm827_vm1 = vcmask (!%p294_p10), 1041408   ;;  %v1802_v18 = vmov (!%p294_p10), 65535   ;;  %v1032_v30 = vld [vmem:[%s2496_s5 + $0x18] sm:$0xff] (!%p294_p10) }
  0x11   : > { %474 = vperm.xlu1 (!%p294_p10), %1703, %v432_v0   ;;  %464 = vperm.xlu0 (!%p294_p10), %1702, %v430_v1   ;;  %v1914_v5 = vshrl.u32 (!%p294_p10), %v379_v2, 7  ;;  %v1030_v7 = vld [vmem:[%s2496_s5 + $0x8] sm:$0xff] (!%p294_p10)  ;;  %v828_v19 = vsel (!%p294_p10), %vm826_vm0, 4294967295, %v1802_v18  ;;  %v434_v22 = vld [vmem:[%s2495_s4 + $0x20] sm:$0xff] (!%p294_p10)  ;;  %v1031_v32 = vld [vmem:[%s2496_s5 + $0x10] sm:$0xff] (!%p294_p10)  ;;  %vm777_vm2 = vcmask (!%p294_p10), 23552  }
  0x12   : > { %868 = vmatprep.mubr.bf16.mxu0 (!%p294_p10), %v1801_v3  ;;  %v435_v21 = vld [vmem:[%s2495_s4 + $0x28] sm:$0xff] (!%p294_p10)  ;;  %v829_v27 = vsel (!%p294_p10), %vm827_vm1, %v828_v19, 0  ;;  %v1705_v34 = vld [vmem:[%s2494_s3] sm:$0xff] (!%p294_p10)   ;;  %v437_v35 = vld [vmem:[%s2495_s4 + $0x38] sm:$0xff] (!%p294_p10)  ;;  %s1643_s23 = sshll.u32 (!%p294_p10), %s1791_s27, 5  ;;  %vm1468_vm3 = vcmp.lt.s32.totalorder (!%p294_p10), %v379_v2, 256 }
  0x13   : > { %v385_v10 = vsub.s32 (!%p294_p10), 1, %v1914_v5  ;;  %v381_v11 = vsub.s32 (!%p294_p10), 0, %v1914_v5  ;;  %v436_v36 = vld [vmem:[%s2495_s4 + $0x30] sm:$0xff] (!%p294_p10)  ;;  %v1034_v37 = vld [vmem:[%s2496_s5 + $0x28] sm:$0xff] (!%p294_p10)  ;;  %v1033_v38 = vld [vmem:[%s2496_s5 + $0x20] sm:$0xff] (!%p294_p10)  ;;  %s2444_s12 = scalar_lea.hbm (!%p294_p10), %s2498_s7, %s1643_s23  ;;  %s1804_s16 = smov (!%p294_p10), [#allocation2]  }
  0x14   : > { %v1706_v39 = vld [vmem:[%s2494_s3 + $0x8] sm:$0xff] (!%p294_p10)   ;;  %v438_v41 = vld [vmem:[%s2495_s4 + $0x40] sm:$0xff] (!%p294_p10)  ;;  %v1036_v42 = vld [vmem:[%s2496_s5 + $0x38] sm:$0xff] (!%p294_p10)  ;;  %s1725_s17 = sshll.u32 (!%p294_p10), %s1804_s16, 4  ;;  %s1726_s17 = int_to_ptr.vmem [resolvable:$false] %s1725_s17 }
  0x15   : > { %479 = vperm.xlu1 (!%p294_p10), %1703, %v433_v4   ;;  %469 = vperm.xlu0 (!%p294_p10), %1702, %v431_v6   ;;  %v439_v40 = vld [vmem:[%s2495_s4 + $0x48] sm:$0xff] (!%p294_p10)  ;;  %v1035_v43 = vld [vmem:[%s2496_s5 + $0x30] sm:$0xff] (!%p294_p10)  ;;  %v441_v45 = vld [vmem:[%s2495_s4 + $0x58] sm:$0xff] (!%p294_p10)  ;;  %s1727_s18 = scalar_lea.vmem (!%p294_p10), %s1726_s17, 64 }
  0x16   : > { %v1707_v44 = vld [vmem:[%s2494_s3 + $0x10] sm:$0xff] (!%p294_p10)   ;;  %v1038_v47 = vld [vmem:[%s2496_s5 + $0x48] sm:$0xff] (!%p294_p10)  ;;  %v1037_v48 = vld [vmem:[%s2496_s5 + $0x40] sm:$0xff] (!%p294_p10) }
  0x17   : > { %s347_s21 = scalar_select %p346_p11, %s1791_s27, 1  ;;  %v440_v46 = vld [vmem:[%s2495_s4 + $0x50] sm:$0xff]  ;;  %v1708_v49 = vld [vmem:[%s2494_s3 + $0x18] sm:$0xff]   ;;  %v443_v50 = vld [vmem:[%s2495_s4 + $0x68] sm:$0xff] }
  0x18   : > { %v442_v51 = vld [vmem:[%s2495_s4 + $0x60] sm:$0xff]  ;;  %v1040_v52 = vld [vmem:[%s2496_s5 + $0x58] sm:$0xff]  ;;  %v1039_v53 = vld [vmem:[%s2496_s5 + $0x50] sm:$0xff] }
  0x19   : > { %s1642_s30 = sshll.u32 %s347_s21, 3  ;;  %s1602_s8 = sshll.u32 %s347_s21, 1  ;;  %1068 = vperm.xlu1 %1703, %v1030_v7   ;;  %1063 = vperm.xlu0 %1702, %v1029_v8   ;;  %v1709_v54 = vld [vmem:[%s2494_s3 + $0x20] sm:$0xff]   ;;  %v445_v55 = vld [vmem:[%s2495_s4 + $0x78] sm:$0xff]  ;;  %v444_v56 = vld [vmem:[%s2495_s4 + $0x70] sm:$0xff] }
  0x1a   : > { %s353_s19 = scalar_lea.vmem %s2491_s0, %s1642_s30  ;;  %s362_s22 = scalar_lea.vmem %s2492_s1, %s1602_s8  ;;  %v1042_v57 = vld [vmem:[%s2496_s5 + $0x68] sm:$0xff]  ;;  %v1041_v58 = vld [vmem:[%s2496_s5 + $0x60] sm:$0xff]  ;;  %v1044_v62 = vld [vmem:[%s2496_s5 + $0x78] sm:$0xff] }
  0x1b   : > { %s371_s10 = scalar_lea.vmem %s2493_s2, %s1602_s8  ;;  %v377_v9 = vld [vmem:[%s353_s19] sm:$0x77]  ;;  %v1710_v59 = vld [vmem:[%s2494_s3 + $0x28] sm:$0xff]   ;;  %v1043_v63 = vld [vmem:[%s2496_s5 + $0x70] sm:$0xff] }
  0x1c   : > { %v375_v12 = vld [vmem:[%s371_s10] sm:$0x3]  ;;  %v390_v15 = vcombine.high %v377_v9, %v377_v9  ;;  %v447_v60 = vld [vmem:[%s2495_s4 + $0x88] sm:$0xff]  ;;  %v1711_v0 = vld [vmem:[%s2494_s3 + $0x30] sm:$0xff]  }
  0x1d   : > { %v396_v13 = vld [vmem:[%s362_s22] sm:$0x3]  ;;  %v376_v14 = vsub.f32 1.0, %v375_v12  ;;  %489 = vperm.xlu1 %1703, %v435_v21   ;;  %484 = vperm.xlu0 %1702, %v434_v22   ;;  %v449_v1 = vld [vmem:[%s2495_s4 + $0x98] sm:$0xff]  ;;  %v448_v4 = vld [vmem:[%s2495_s4 + $0x90] sm:$0xff]  ;;  %s342_s22 = sand.u32 1, %s1783_s25  }
  0x1e   : > { %v446_v61 = vld [vmem:[%s2495_s4 + $0x80] sm:$0xff]  ;;  %v1046_v6 = vld [vmem:[%s2496_s5 + $0x88] sm:$0xff]  ;;  %v1712_v8 = vld [vmem:[%s2494_s3 + $0x38] sm:$0xff]   ;;  %s1599_s21 = sshll.u32 %s342_s22, 1  ;;  %s1472_s27 = scalar_lea.sflag [#allocation3], %s342_s22 }
  0x1f   : > { %v386_v16 = vrot.slane %v376_v14, %v385_v10  ;;  %v397_v17 = vmul.f32 %v396_v13, %v376_v14  ;;  %v382_v20 = vrot.slane %v376_v14, %v381_v11  ;;  %v1045_v7 = vld [vmem:[%s2496_s5 + $0x80] sm:$0xff]  ;;  %v1047_v12 = vld [vmem:[%s2496_s5 + $0x90] sm:$0xff]  ;;  %v453_v14 = vld [vmem:[%s2495_s4 + $0xb8] sm:$0xff]  ;;  %s344_s10 = scalar_lea.vmem [#allocation2], %s1599_s21 }
  0x20   : > { %v1713_v13 = vld [vmem:[%s2494_s3 + $0x40] sm:$0xff]   ;;  %v1714_v18 = vld [vmem:[%s2494_s3 + $0x48] sm:$0xff]   ;;  %v1052_v21 = vld [vmem:[%s2496_s5 + $0xb8] sm:$0xff]  ;;  %s1488_s9 = sshll.u32 %s344_s10, 4  ;;  %s2446_s9 = int_to_ptr.vmem [resolvable:$true] %s1488_s9 }
  0x21   : > { %v393_v23 = vmul.f32 %v390_v15, %v386_v16  ;;  %v1944_v24 = vrot.slane %v397_v17, %v385_v10  ;;  %v392_v25 = vmul.f32 %v382_v20, %v377_v9  ;;  %v1946_v26 = vrot.slane %v397_v17, %v381_v11  ;;  %1078 = vperm.xlu1 %1703, %v1032_v30   ;;  %v451_v9 = vld [vmem:[%s2495_s4 + $0xa8] sm:$0xff]  ;;  %v450_v10 = vld [vmem:[%s2495_s4 + $0xa0] sm:$0xff]  ;;  %v1048_v11 = vld [vmem:[%s2496_s5 + $0x98] sm:$0xff]  ;;  %s1721_s15 = scalar_lea.vmem %s2446_s9, 32  ;;  %p1728_p1 = scmp.lt.s32.totalorder %s2446_s9, %s1726_s17 }
  0x22   : > { %1073 = vperm.xlu0 %1702, %v1031_v32   ;;  %v452_v15 = vld [vmem:[%s2495_s4 + $0xb0] sm:$0xff]  ;;  %v1050_v16 = vld [vmem:[%s2496_s5 + $0xa8] sm:$0xff]  ;;  %v1049_v17 = vld [vmem:[%s2496_s5 + $0xa0] sm:$0xff]  ;;  %p1722_p12 = scmp.ne.s32.totalorder %s2446_s9, %s1721_s15  ;;  %p1729_p2 = scmp.lt.s32.totalorder %s1727_s18, %s1721_s15 }
  0x23   : > { %v395_v28 = vpack.c.bf16 %v393_v23, %v393_v23  ;;  %v394_v29 = vpack.c.bf16 %v392_v25, %v392_v25  ;;  %v455_v19 = vld [vmem:[%s2495_s4 + $0xc8] sm:$0xff]  ;;  %v454_v20 = vld [vmem:[%s2495_s4 + $0xc0] sm:$0xff]  ;;  %v1051_v22 = vld [vmem:[%s2496_s5 + $0xb0] sm:$0xff] }
  0x24   : > { %v1715_v23 = vld [vmem:[%s2494_s3 + $0x50] sm:$0xff]   ;;  %v457_v25 = vld [vmem:[%s2495_s4 + $0xd8] sm:$0xff]  ;;  %v458_v32 = vld [vmem:[%s2495_s4 + $0xe0] sm:$0xff]  ;;  %p1723_p13 = pnand %p1722_p12, %p1885_p4  ;;  %p1730_p3 = por %p1729_p2, %p1728_p1 }
  0x25   : > { %v834_v31 = vand.u32 %v829_v27, %v395_v28  ;;  %v831_v33 = vand.u32 %v829_v27, %v394_v29  ;;  %499 = vperm.xlu1 %1703, %v437_v35   ;;  %v456_v27 = vld [vmem:[%s2495_s4 + $0xd0] sm:$0xff]  ;;  %v1054_v28 = vld [vmem:[%s2496_s5 + $0xc8] sm:$0xff]  ;;  %v1053_v29 = vld [vmem:[%s2496_s5 + $0xc0] sm:$0xff] }
  0x26   : > { %494 = vperm.xlu0 %1702, %v436_v36   ;;  %v1716_v30 = vld [vmem:[%s2494_s3 + $0x58] sm:$0xff]   ;;  %v1717_v35 = vld [vmem:[%s2494_s3 + $0x60] sm:$0xff]   ;;  %p1724_p0 = pneg %p1723_p13 }
  0x27   : > { %836 = vmatprep.subr.bf16.mxu0 %v834_v31  ;;  %v459_v31 = vld [vmem:[%s2495_s4 + $0xe8] sm:$0xff]  ;;  %v461_v36 = vld [vmem:[%s2495_s4 + $0xf8] sm:$0xff] }
  0x28   : > { %837 = vmatpush1.bf16.msra.mxu0 %v831_v33  ;;  %v1056_v33 = vld [vmem:[%s2496_s5 + $0xd8] sm:$0xff]  ;;  %p1731_p5 = pnand %p1730_p3, %p1724_p0 }
  0x29   : > { %1088 = vperm.xlu1 %1703, %v1034_v37   ;;  %v460_v37 = vld [vmem:[%s2495_s4 + $0xf0] sm:$0xff] }
  0x2a   : > { %1083 = vperm.xlu0 %1702, %v1033_v38   ;;  %v1058_v38 = vld [vmem:[%s2496_s5 + $0xe8] sm:$0xff] }
  0x2b   : > { %1620 = vmatmul.mubr.msk.bf16.vlgmr.msra.gmra.mrb[0].mxu0 %vm777_vm2, %v1705_v34  ;;  %v1055_v34 = vld [vmem:[%s2496_s5 + $0xd0] sm:$0xff] }
  0x2c   : > { %878 = vmatprep.mubr.bf16.mxu0 %v1801_v3 }
  0x2d   : > { %509 = vperm.xlu1 %1703, %v439_v40   ;;  %v1718_v40 = vld [vmem:[%s2494_s3 + $0x68] sm:$0xff]  }
  0x2e   : > { %504 = vperm.xlu0 %1702, %v438_v41   ;;  %v1060_v41 = vld [vmem:[%s2496_s5 + $0xf8] sm:$0xff] }
  0x31   : > { %1098 = vperm.xlu1 %1703, %v1036_v42   ;;  %v1059_v42 = vld [vmem:[%s2496_s5 + $0xf0] sm:$0xff] }
  0x32   : > { %1093 = vperm.xlu0 %1702, %v1035_v43   ;;  %v1719_v43 = vld [vmem:[%s2494_s3 + $0x70] sm:$0xff]  }
  0x33   : > { %1621 = vmatmul.mubr.msk.bf16.gmra.mrb[4].mxu0 %vm777_vm2, %v1706_v39  ;;  %v1057_v39 = vld [vmem:[%s2496_s5 + $0xe0] sm:$0xff] }
  0x34   : > { %888 = vmatprep.mubr.bf16.mxu0 %v1801_v3 }
  0x35   : > { %519 = vperm.xlu1 %1703, %v441_v45  }
  0x36   : > { %514 = vperm.xlu0 %1702, %v440_v46  }
  0x39   : > { %1108 = vperm.xlu1 %1703, %v1038_v47  }
  0x3a   : > { %1103 = vperm.xlu0 %1702, %v1037_v48  }
  0x3b   : > { %1622 = vmatmul.mubr.msk.bf16.gmra.mrb[8].mxu0 %vm777_vm2, %v1707_v44  ;;  %v1720_v44 = vld [vmem:[%s2494_s3 + $0x78] sm:$0xff]  }
  0x3c   : > { %898 = vmatprep.mubr.bf16.mxu0 %v1801_v3 }
  0x3d   : > { %529 = vperm.xlu1 %1703, %v443_v50  }
  0x3e   : > { %524 = vperm.xlu0 %1702, %v442_v51  }
  0x41   : > { %1118 = vperm.xlu1 %1703, %v1040_v52  }
  0x42   : > { %1113 = vperm.xlu0 %1702, %v1039_v53  }
  0x43   : > { %1623 = vmatmul.mubr.msk.bf16.gmra.mrb[12].mxu0 %vm777_vm2, %v1708_v49 }
  0x44   : > { %908 = vmatprep.mubr.bf16.mxu0 %v1801_v3 }
  0x45   : > { %539 = vperm.xlu1 %1703, %v445_v55  }
  0x46   : > { %534 = vperm.xlu0 %1702, %v444_v56  }
  0x49   : > { %1128 = vperm.xlu1 %1703, %v1042_v57  }
  0x4a   : > { %1123 = vperm.xlu0 %1702, %v1041_v58  }
  0x4b   : > { %1624 = vmatmul.mubr.msk.bf16.gmra.mrb[16].mxu0 %vm777_vm2, %v1709_v54 }
  0x4c   : > { %918 = vmatprep.mubr.bf16.mxu0 %v1801_v3 }
  0x4d   : > { %549 = vperm.xlu1 %1703, %v447_v60  }
  0x4e   : > { %544 = vperm.xlu0 %1702, %v446_v61  }
  0x51   : > { %1138 = vperm.xlu1 %1703, %v1044_v62  }
  0x52   : > { %1133 = vperm.xlu0 %1702, %v1043_v63  }
  0x53   : > { %1625 = vmatmul.mubr.msk.bf16.gmra.mrb[20].mxu0 %vm777_vm2, %v1710_v59 }
  0x54   : > { %928 = vmatprep.mubr.bf16.mxu0 %v1801_v3 }
  0x55   : > { %559 = vperm.xlu1 %1703, %v449_v1  }
  0x56   : > { %554 = vperm.xlu0 %1702, %v448_v4  }
  0x59   : > { %1148 = vperm.xlu1 %1703, %v1046_v6  }
  0x5a   : > { %1143 = vperm.xlu0 %1702, %v1045_v7  }
  0x5b   : > { %1626 = vmatmul.mubr.msk.bf16.gmra.mrb[24].mxu0 %vm777_vm2, %v1711_v0 }
  0x5c   : > { %938 = vmatprep.mubr.bf16.mxu0 %v1801_v3 }
  0x5d   : > { %569 = vperm.xlu1 %1703, %v451_v9  }
  0x5e   : > { %564 = vperm.xlu0 %1702, %v450_v10  }
  0x61   : > { %1158 = vperm.xlu1 %1703, %v1048_v11  }
  0x62   : > { %1153 = vperm.xlu0 %1702, %v1047_v12  }
  0x63   : > { %1627 = vmatmul.mubr.msk.bf16.gmra.mrb[28].mxu0 %vm777_vm2, %v1712_v8  ;;  %v1803_v8 = vmov 1966171168  }
  0x64   : > { %948 = vmatprep.mubr.bf16.mxu0 %v1801_v3  ;;  %v1392_v9 = vunpack.c.l.s4 %v1803_v8 }
  0x65   : > { %579 = vperm.xlu1 %1703, %v453_v14  }
  0x66   : > { %574 = vperm.xlu0 %1702, %v452_v15   ;;  %v1393_v15 = vunpack.c.0.s8 %v1392_v9 }
  0x69   : > { %1168 = vperm.xlu1 %1703, %v1050_v16  }
  0x6a   : > { %1163 = vperm.xlu0 %1702, %v1049_v17  }
  0x6b   : > { %1628 = vmatmul.mubr.msk.bf16.gmra.mrb[32].mxu0 %vm777_vm2, %v1713_v13 }
  0x6c   : > { %958 = vmatprep.mubr.bf16.mxu0 %v1801_v3 }
  0x6d   : > { %589 = vperm.xlu1 %1703, %v455_v19   ;;  %v2236_v19 = vld.sshfl [vmem:[%s2497_s6] sm:$0x11 pattern:$0x75316420] }
  0x6e   : > { %584 = vperm.xlu0 %1702, %v454_v20  }
  0x71   : > { %1178 = vperm.xlu1 %1703, %v1052_v21  }
  0x72   : > { %1173 = vperm.xlu0 %1702, %v1051_v22  }
  0x73   : > { %1629 = vmatmul.mubr.msk.bf16.gmra.mrb[36].mxu0 %vm777_vm2, %v1714_v18 }
  0x74   : > { %968 = vmatprep.mubr.bf16.mxu0 %v1801_v3 }
  0x75   : > { %599 = vperm.xlu1 %1703, %v457_v25   ;;  %v2241_v25 = vsub.s32 %v1393_v15, %v1914_v5 }
  0x76   : > { %594 = vperm.xlu0 %1702, %v456_v27  }
  0x79   : > { %1188 = vperm.xlu1 %1703, %v1054_v28  }
  0x7a   : > { %1183 = vperm.xlu0 %1702, %v1053_v29  }
  0x7b   : > { %1630 = vmatmul.mubr.msk.bf16.gmra.mrb[40].mxu0 %vm777_vm2, %v1715_v23  ;;  %v1390_v23 = vcombine.high %v2236_v19, %v2236_v19 }
  0x7c   : > { %978 = vmatprep.mubr.bf16.mxu0 %v1801_v3 }
  0x7d   : > { %609 = vperm.xlu1 %1703, %v459_v31  }
  0x7e   : > { %604 = vperm.xlu0 %1702, %v458_v32  }
  0x81   : > { %1198 = vperm.xlu1 %1703, %v1056_v33  }
  0x82   : > { %1193 = vperm.xlu0 %1702, %v1055_v34  }
  0x83   : > { %1631 = vmatmul.mubr.msk.bf16.gmra.mrb[44].mxu0 %vm777_vm2, %v1716_v30 }
  0x84   : > { %988 = vmatprep.mubr.bf16.mxu0 %v1801_v3 }
  0x85   : > { %619 = vperm.xlu1 %1703, %v461_v36  }
  0x86   : > { %614 = vperm.xlu0 %1702, %v460_v37  }
  0x89   : > { %1208 = vperm.xlu1 %1703, %v1058_v38  }
  0x8a   : > { %1203 = vperm.xlu0 %1702, %v1057_v39  }
  0x8b   : > { %1632 = vmatmul.mubr.msk.bf16.gmra.mrb[48].mxu0 %vm777_vm2, %v1717_v35  ;;  %v1404_v35 = vrot.slane %v1390_v23, %v2241_v25 }
  0x8c   : > { %998 = vmatprep.mubr.bf16.mxu0 %v1801_v3 }
  0x8d   : > { %1218 = vperm.xlu1 %1703, %v1060_v41   ;;  %1439 = vmatprep.mubr.bf16.mxu1 %v1404_v35 }
  0x8e   : > { %1213 = vperm.xlu0 %1702, %v1059_v42  }
  0x90   : > { %v465_v45 = vpop.permute.xlu0 %464  ;;  %v475_v46 = vpop.permute.xlu1 %474 }
  0x91   : > { %v633_v4 = vmul.f32 %v1946_v26, %v465_v45  ;;  %v634_v6 = vmul.f32 %v1944_v24, %v465_v45  ;;  %v637_v32 = vmul.f32 %v1946_v26, %v475_v46  ;;  %v638_v36 = vmul.f32 %v1944_v24, %v475_v46 }
  0x93   : > { %1633 = vmatmul.mubr.msk.bf16.gmra.mrb[52].mxu0 %vm777_vm2, %v1718_v40 }
  0x94   : > { %1008 = vmatprep.mubr.bf16.mxu0 %v1801_v3  ;;  %v470_v47 = vpop.permute.xlu0 %469  ;;  %v480_v48 = vpop.permute.xlu1 %479 }
  0x95   : > { %v635_v7 = vmul.f32 %v1946_v26, %v470_v47  ;;  %v636_v10 = vmul.f32 %v1944_v24, %v470_v47  ;;  %v639_v40 = vmul.f32 %v1946_v26, %v480_v48 }
  0x98   : > { %v1064_v49 = vpop.permute.xlu0 %1063  ;;  %v1069_v50 = vpop.permute.xlu1 %1068 }
  0x9b   : > { %1634 = vmatmul.mubr.msk.bf16.gmra.mrb[56].mxu0 %vm777_vm2, %v1719_v43 }
  0x9c   : > { %1018 = vmatprep.mubr.bf16.mxu0 %v1801_v3  ;;  %v2195_v51 = vpop.permute.xlu0 %484  ;;  %v2197_v52 = vpop.permute.xlu1 %489 }
  0x9d   : > { %v642_v15 = vmul.f32 %v1944_v24, %v2195_v51 }
  0xa0   : > { %v2199_v54 = vpop.permute.xlu1 %1078 }
  0xa1   : > { %v1074_v53 = vpop.permute.xlu0 %1073 }
  0xa3   : > { %1635 = vmatmul.mubr.msk.bf16.gmra.mrb[60].mxu0 %vm777_vm2, %v1720_v44  ;;  %v640_v44 = vmul.f32 %v1944_v24, %v480_v48  ;;  %v641_v48 = vmul.f32 %v1946_v26, %v2195_v51 }
  0xa4   : > { %v2203_v55 = vpop.permute.xlu1 %499 }
  0xa5   : > { %v2201_v3 = vpop.permute.xlu0 %494 }
  0xa8   : > { %v2207_v57 = vpop.permute.xlu1 %1088 }
  0xa9   : > { %v2205_v56 = vpop.permute.xlu0 %1083 }
  0xac   : > { %v2211_v59 = vpop.permute.xlu1 %509 }
  0xad   : > { %v2209_v58 = vpop.permute.xlu0 %504 }
  0xb0   : > { %v2215_v61 = vpop.permute.xlu1 %1098 }
  0xb1   : > { %v2213_v60 = vpop.permute.xlu0 %1093 }
  0xb4   : > { %v2219_v63 = vpop.permute.xlu1 %519 }
  0xb5   : > { %v2217_v62 = vpop.permute.xlu0 %514 }
  0xb8   : > { %v2223_v1 = vpop.permute.xlu1 %1108 }
  0xb9   : > { %v2221_v0 = vpop.permute.xlu0 %1103 }
  0xbc   : > { %v2231_v16 = vpop.permute.xlu1 %529 }
  0xbd   : > { %v2229_v11 = vpop.permute.xlu0 %524 }
  0xc0   : > { %v2248_v37 = vpop.permute.xlu1 %1118 }
  0xc1   : > { %v2243_v30 = vpop.permute.xlu0 %1113 }
  0xc5   : > { %v2252_v46 = vpop.permute.xlu0 %534 }
  0xfe   : > { %v870_v12 = vpop.f32.mrb[0].mxu0 }
  0xff   : > { %v871_v13 = vadd.f32 %v870_v12, %v633_v4  ;;  %v872_v14 = vpop.f32.mrb[1].mxu0 }
 0x100   : > { %v873_v17 = vadd.f32 %v872_v14, %v634_v6  ;;  %v874_v18 = vpop.f32.mrb[2].mxu0 }
 0x101   : > { %v1221_v20 = vadd.f32 %v1064_v49, %v871_v13  ;;  %v875_v21 = vadd.f32 %v874_v18, %v635_v7  ;;  %v876_v22 = vpop.f32.mrb[3].mxu0 }
 0x102   : > { %v877_v27 = vadd.f32 %v876_v22, %v636_v10  ;;  %v1222_v28 = vadd.f32 %v1064_v49, %v873_v17  ;;  %v2255_v10 = vpop.permute.xlu1 %539 }
 0x103   : > { %v1223_v29 = vadd.f32 %v1069_v50, %v875_v21  ;;  %v1285_v33 = vmax.f32 %v1221_v20, 0.0  ;;  %v643_v20 = vmul.f32 %v1946_v26, %v2197_v52 }
 0x104   : > { %v1224_v31 = vadd.f32 %v1069_v50, %v877_v27  ;;  %v1286_v39 = vmax.f32 %v1222_v28, 0.0  ;;  %v2266_v27 = vpop.permute.xlu0 %1123 }
 0x105   : > { %v1287_v34 = vmax.f32 %v1223_v29, 0.0 }
 0x106   : > { %v880_v38 = vpop.f32.mrb[4].mxu0  ;;  %v1288_v5 = vmax.f32 %v1224_v31, 0.0 }
 0x107   : > { %v881_v41 = vadd.f32 %v880_v38, %v637_v32  ;;  %v882_v42 = vpop.f32.mrb[5].mxu0  ;;  %v1350_v43 = vpack.c.bf16 %v1287_v34, %v1285_v33  ;;  %v2269_v34 = vpop.permute.xlu1 %1128 }
 0x108   : > { %v883_v45 = vadd.f32 %v882_v42, %v638_v36  ;;  %v884_v47 = vpop.f32.mrb[6].mxu0  ;;  %v1351_v49 = vpack.c.bf16 %v1288_v5, %v1286_v39  ;;  %v645_v39 = vmul.f32 %v1946_v26, %v2201_v3  ;;  %v2278_v42 = vpop.permute.xlu0 %544 }
 0x109   : > { %v1225_v50 = vadd.f32 %v1074_v53, %v881_v41  ;;  %v885_v4 = vadd.f32 %v884_v47, %v639_v40  ;;  %v886_v6 = vpop.f32.mrb[7].mxu0  ;;  %v646_v41 = vmul.f32 %v1944_v24, %v2201_v3 }
 0x10a   : > { %v1226_v7 = vadd.f32 %v1074_v53, %v883_v45  ;;  %v887_v8 = vadd.f32 %v886_v6, %v640_v44  ;;  %1407 = vmatprep.subr.bf16.mxu1 %v1351_v49  ;;  %v647_v45 = vmul.f32 %v1946_v26, %v2203_v55 }
 0x10b   : > { %v1227_v9 = vadd.f32 %v2199_v54, %v885_v4  ;;  %1408 = vmatpush1.bf16.msra.mxu1 %v1350_v43  ;;  %v1289_v13 = vmax.f32 %v1225_v50, 0.0  ;;  %v2284_v4 = vpop.permute.xlu1 %549 }
 0x10c   : > { %v1228_v12 = vadd.f32 %v2199_v54, %v887_v8  ;;  %v1290_v17 = vmax.f32 %v1226_v7, 0.0  ;;  %v644_v54 = vmul.f32 %v1944_v24, %v2197_v52 }
 0x10d   : > { %v1291_v14 = vmax.f32 %v1227_v9, 0.0 }
 0x10e   : > { %v1292_v18 = vmax.f32 %v1228_v12, 0.0  ;;  %v890_v53 = vpop.f32.mrb[8].mxu0 }
 0x10f   : > { %v891_v21 = vadd.f32 %v890_v53, %v641_v48  ;;  %v892_v22 = vpop.f32.mrb[9].mxu0  ;;  %v1352_v23 = vpack.c.bf16 %v1291_v14, %v1289_v13 }
 0x110   : > { %v893_v28 = vadd.f32 %v892_v22, %v642_v15  ;;  %v894_v29 = vpop.f32.mrb[10].mxu0  ;;  %v1353_v31 = vpack.c.bf16 %v1292_v18, %v1290_v17  ;;  %v2289_v15 = vpop.permute.xlu0 %1133  ;;  %v649_v17 = vmul.f32 %v1946_v26, %v2209_v58 }
 0x111   : > { %v1229_v32 = vadd.f32 %v2205_v56, %v891_v21  ;;  %v895_v51 = vadd.f32 %v894_v29, %v643_v20  ;;  %v896_v33 = vpop.f32.mrb[11].mxu0  ;;  %v650_v20 = vmul.f32 %v1944_v24, %v2209_v58  ;;  %v2296_v21 = vpop.permute.xlu1 %1138 }
 0x112   : > { %v1230_v35 = vadd.f32 %v2205_v56, %v893_v28  ;;  %v897_v36 = vadd.f32 %v896_v33, %v644_v54  ;;  %1409 = vmatprep.subr.bf16.mxu1 %v1353_v31  ;;  %v651_v54 = vmul.f32 %v1946_v26, %v2211_v59 }
 0x113   : > { %v1231_v38 = vadd.f32 %v2207_v57, %v895_v51  ;;  %1410 = vmatpush1.bf16.msra.mxu1 %v1352_v23  ;;  %v1293_v5 = vmax.f32 %v1229_v32, 0.0 }
 0x114   : > { %v1232_v52 = vadd.f32 %v2207_v57, %v897_v36  ;;  %v1294_v43 = vmax.f32 %v1230_v35, 0.0  ;;  %v648_v57 = vmul.f32 %v1944_v24, %v2203_v55 }
 0x115   : > { %v1295_v40 = vmax.f32 %v1231_v38, 0.0  ;;  %v2303_v38 = vpop.permute.xlu0 %554 }
 0x116   : > { %v1296_v44 = vmax.f32 %v1232_v52, 0.0  ;;  %v900_v56 = vpop.f32.mrb[12].mxu0 }
 0x117   : > { %v901_v47 = vadd.f32 %v900_v56, %v645_v39  ;;  %v902_v49 = vpop.f32.mrb[13].mxu0  ;;  %v1354_v50 = vpack.c.bf16 %v1295_v40, %v1293_v5  ;;  %v2307_v40 = vpop.permute.xlu1 %559  ;;  %v654_v56 = vmul.f32 %v1944_v24, %v2217_v62 }
 0x118   : > { %v903_v6 = vadd.f32 %v902_v49, %v646_v41  ;;  %v904_v7 = vpop.f32.mrb[14].mxu0  ;;  %v1355_v8 = vpack.c.bf16 %v1296_v44, %v1294_v43  ;;  %v653_v41 = vmul.f32 %v1946_v26, %v2217_v62  ;;  %v655_v49 = vmul.f32 %v1946_v26, %v2219_v63 }
 0x119   : > { %v1233_v3 = vadd.f32 %v2213_v60, %v901_v47  ;;  %v905_v9 = vadd.f32 %v904_v7, %v647_v45  ;;  %v906_v12 = vpop.f32.mrb[15].mxu0  ;;  %v2318_v7 = vpop.permute.xlu0 %1143 }
 0x11a   : > { %v1234_v48 = vadd.f32 %v2213_v60, %v903_v6  ;;  %v907_v13 = vadd.f32 %v906_v12, %v648_v57  ;;  %1411 = vmatprep.subr.bf16.mxu1 %v1355_v8 }
 0x11b   : > { %v1235_v14 = vadd.f32 %v2215_v61, %v905_v9  ;;  %1412 = vmatpush1.bf16.msra.mxu1 %v1354_v50  ;;  %v1297_v18 = vmax.f32 %v1233_v3, 0.0 }
 0x11c   : > { %v1236_v55 = vadd.f32 %v2215_v61, %v907_v13  ;;  %v1298_v60 = vmax.f32 %v1234_v48, 0.0  ;;  %v652_v61 = vmul.f32 %v1944_v24, %v2211_v59  ;;  %v2321_v13 = vpop.permute.xlu1 %1148 }
 0x11d   : > { %v1299_v53 = vmax.f32 %v1235_v14, 0.0 }
 0x11e   : > { %v1300_v22 = vmax.f32 %v1236_v55, 0.0  ;;  %v910_v23 = vpop.f32.mrb[16].mxu0 }
 0x11f   : > { %v911_v28 = vadd.f32 %v910_v23, %v649_v17  ;;  %v912_v29 = vpop.f32.mrb[17].mxu0  ;;  %v1356_v31 = vpack.c.bf16 %v1299_v53, %v1297_v18  ;;  %v657_v18 = vmul.f32 %v1946_v26, %v2229_v11 }
 0x120   : > { %v913_v32 = vadd.f32 %v912_v29, %v650_v20  ;;  %v914_v51 = vpop.f32.mrb[18].mxu0  ;;  %v1357_v33 = vpack.c.bf16 %v1300_v22, %v1298_v60  ;;  %v658_v60 = vmul.f32 %v1944_v24, %v2229_v11  ;;  %v2330_v22 = vpop.permute.xlu0 %564 }
 0x121   : > { %v1237_v35 = vadd.f32 %v2221_v0, %v911_v28  ;;  %v915_v58 = vadd.f32 %v914_v51, %v651_v54  ;;  %v916_v36 = vpop.f32.mrb[19].mxu0  ;;  %v659_v28 = vmul.f32 %v1946_v26, %v2231_v16 }
 0x122   : > { %v1238_v52 = vadd.f32 %v2221_v0, %v913_v32  ;;  %v917_v39 = vadd.f32 %v916_v36, %v652_v61  ;;  %1413 = vmatprep.subr.bf16.mxu1 %v1357_v33  ;;  %v2336_v32 = vpop.permute.xlu1 %569 }
 0x123   : > { %v1239_v5 = vadd.f32 %v2223_v1, %v915_v58  ;;  %1414 = vmatpush1.bf16.msra.mxu1 %v1356_v31  ;;  %v1301_v43 = vmax.f32 %v1237_v35, 0.0 }
 0x124   : > { %v1240_v59 = vadd.f32 %v2223_v1, %v917_v39  ;;  %v1302_v45 = vmax.f32 %v1238_v52, 0.0  ;;  %v656_v1 = vmul.f32 %v1944_v24, %v2219_v63 }
 0x125   : > { %v1303_v44 = vmax.f32 %v1239_v5, 0.0 }
 0x126   : > { %v1304_v47 = vmax.f32 %v1240_v59, 0.0  ;;  %v920_v0 = vpop.f32.mrb[20].mxu0  ;;  %v2341_v59 = vpop.permute.xlu0 %1153 }
 0x127   : > { %v921_v50 = vadd.f32 %v920_v0, %v653_v41  ;;  %v922_v57 = vpop.f32.mrb[21].mxu0  ;;  %v1358_v6 = vpack.c.bf16 %v1303_v44, %v1301_v43  ;;  %v661_v41 = vmul.f32 %v1946_v26, %v2252_v46 }
 0x128   : > { %v923_v8 = vadd.f32 %v922_v57, %v654_v56  ;;  %v924_v3 = vpop.f32.mrb[22].mxu0  ;;  %v1359_v9 = vpack.c.bf16 %v1304_v47, %v1302_v45  ;;  %v662_v56 = vmul.f32 %v1944_v24, %v2252_v46  ;;  %v2348_v45 = vpop.permute.xlu1 %1158 }
 0x129   : > { %v1241_v12 = vadd.f32 %v2243_v30, %v921_v50  ;;  %v925_v62 = vadd.f32 %v924_v3, %v655_v49  ;;  %v926_v48 = vpop.f32.mrb[23].mxu0  ;;  %v663_v49 = vmul.f32 %v1946_v26, %v2255_v10 }
 0x12a   : > { %v1242_v14 = vadd.f32 %v2243_v30, %v923_v8  ;;  %v927_v55 = vadd.f32 %v926_v48, %v656_v1  ;;  %1415 = vmatprep.subr.bf16.mxu1 %v1359_v9 }
 0x12b   : > { %v1243_v17 = vadd.f32 %v2248_v37, %v925_v62  ;;  %1416 = vmatpush1.bf16.msra.mxu1 %v1358_v6  ;;  %v1305_v53 = vmax.f32 %v1241_v12, 0.0  ;;  %v2355_v62 = vpop.permute.xlu0 %574 }
 0x12c   : > { %v1244_v63 = vadd.f32 %v2248_v37, %v927_v55  ;;  %v1306_v23 = vmax.f32 %v1242_v14, 0.0  ;;  %v660_v37 = vmul.f32 %v1944_v24, %v2231_v16 }
 0x12d   : > { %v1307_v20 = vmax.f32 %v1243_v17, 0.0  ;;  %v2359_v17 = vpop.permute.xlu1 %579 }
 0x12e   : > { %v1308_v54 = vmax.f32 %v1244_v63, 0.0  ;;  %v930_v30 = vpop.f32.mrb[24].mxu0  ;;  %v665_v63 = vmul.f32 %v1946_v26, %v2278_v42 }
 0x12f   : > { %v931_v29 = vadd.f32 %v930_v30, %v657_v18  ;;  %v932_v31 = vpop.f32.mrb[25].mxu0  ;;  %v1360_v61 = vpack.c.bf16 %v1307_v20, %v1305_v53  ;;  %v666_v20 = vmul.f32 %v1944_v24, %v2278_v42 }
 0x130   : > { %v933_v51 = vadd.f32 %v932_v31, %v658_v60  ;;  %v934_v33 = vpop.f32.mrb[26].mxu0  ;;  %v1361_v35 = vpack.c.bf16 %v1308_v54, %v1306_v23  ;;  %v667_v54 = vmul.f32 %v1946_v26, %v2284_v4  ;;  %v1164_v31 = vpop.permute.xlu0 %1163 }
 0x131   : > { %v1245_v11 = vadd.f32 %v2266_v27, %v931_v29  ;;  %v935_v58 = vadd.f32 %v934_v33, %v659_v28  ;;  %v936_v36 = vpop.f32.mrb[27].mxu0 }
 0x132   : > { %v1246_v52 = vadd.f32 %v2266_v27, %v933_v51  ;;  %v937_v39 = vadd.f32 %v936_v36, %v660_v37  ;;  %1417 = vmatprep.subr.bf16.mxu1 %v1361_v35 }
 0x133   : > { %v1247_v5 = vadd.f32 %v2269_v34, %v935_v58  ;;  %1418 = vmatpush1.bf16.msra.mxu1 %v1360_v61  ;;  %v1309_v43 = vmax.f32 %v1245_v11, 0.0  ;;  %v1169_v11 = vpop.permute.xlu1 %1168 }
 0x134   : > { %v1248_v16 = vadd.f32 %v2269_v34, %v937_v39  ;;  %v1310_v27 = vmax.f32 %v1246_v52, 0.0  ;;  %v664_v34 = vmul.f32 %v1944_v24, %v2255_v10 }
 0x135   : > { %v1311_v44 = vmax.f32 %v1247_v5, 0.0 }
 0x136   : > { %v1312_v47 = vmax.f32 %v1248_v16, 0.0  ;;  %v940_v0 = vpop.f32.mrb[28].mxu0 }
 0x137   : > { %v941_v50 = vadd.f32 %v940_v0, %v661_v41  ;;  %v942_v57 = vpop.f32.mrb[29].mxu0  ;;  %v1362_v6 = vpack.c.bf16 %v1311_v44, %v1309_v43  ;;  %v670_v41 = vmul.f32 %v1944_v24, %v2303_v38  ;;  %v2378_v43 = vpop.permute.xlu0 %584 }
 0x138   : > { %v943_v1 = vadd.f32 %v942_v57, %v662_v56  ;;  %v944_v8 = vpop.f32.mrb[30].mxu0  ;;  %v1363_v3 = vpack.c.bf16 %v1312_v47, %v1310_v27  ;;  %v671_v27 = vmul.f32 %v1946_v26, %v2307_v40 }
 0x139   : > { %v1249_v9 = vadd.f32 %v2289_v15, %v941_v50  ;;  %v945_v46 = vadd.f32 %v944_v8, %v663_v49  ;;  %v946_v12 = vpop.f32.mrb[31].mxu0  ;;  %v2384_v50 = vpop.permute.xlu1 %589 }
 0x13a   : > { %v1250_v48 = vadd.f32 %v2289_v15, %v943_v1  ;;  %v947_v14 = vadd.f32 %v946_v12, %v664_v34  ;;  %1419 = vmatprep.subr.bf16.mxu1 %v1363_v3 }
 0x13b   : > { %v1251_v55 = vadd.f32 %v2296_v21, %v945_v46  ;;  %1420 = vmatpush1.bf16.msra.mxu1 %v1362_v6  ;;  %v1313_v18 = vmax.f32 %v1249_v9, 0.0  ;;  %v1174_v12 = vpop.permute.xlu0 %1173 }
 0x13c   : > { %v1252_v10 = vadd.f32 %v2296_v21, %v947_v14  ;;  %v1314_v60 = vmax.f32 %v1250_v48, 0.0  ;;  %v668_v21 = vmul.f32 %v1944_v24, %v2284_v4  ;;  %v669_v4 = vmul.f32 %v1946_v26, %v2303_v38 }
 0x13d   : > { %v1315_v53 = vmax.f32 %v1251_v55, 0.0 }
 0x13e   : > { %v1316_v23 = vmax.f32 %v1252_v10, 0.0  ;;  %v950_v15 = vpop.f32.mrb[32].mxu0  ;;  %v674_v10 = vmul.f32 %v1944_v24, %v2330_v22 }
 0x13f   : > { %v951_v30 = vadd.f32 %v950_v15, %v665_v63  ;;  %v952_v28 = vpop.f32.mrb[33].mxu0  ;;  %v1364_v29 = vpack.c.bf16 %v1315_v53, %v1313_v18  ;;  %v1179_v63 = vpop.permute.xlu1 %1178 }
 0x140   : > { %v953_v61 = vadd.f32 %v952_v28, %v666_v20  ;;  %v954_v37 = vpop.f32.mrb[34].mxu0  ;;  %v1365_v51 = vpack.c.bf16 %v1316_v23, %v1314_v60  ;;  %v675_v20 = vmul.f32 %v1946_v26, %v2336_v32 }
 0x141   : > { %v1253_v33 = vadd.f32 %v2318_v7, %v951_v30  ;;  %v955_v35 = vadd.f32 %v954_v37, %v667_v54  ;;  %v956_v42 = vpop.f32.mrb[35].mxu0 }
 0x142   : > { %v1254_v58 = vadd.f32 %v2318_v7, %v953_v61  ;;  %v957_v36 = vadd.f32 %v956_v42, %v668_v21  ;;  %1421 = vmatprep.subr.bf16.mxu1 %v1365_v51 }
 0x143   : > { %v1255_v52 = vadd.f32 %v2321_v13, %v955_v35  ;;  %1422 = vmatpush1.bf16.msra.mxu1 %v1364_v29  ;;  %v1317_v5 = vmax.f32 %v1253_v33, 0.0  ;;  %v2400_v35 = vpop.permute.xlu1 %599 }
 0x144   : > { %v1256_v39 = vadd.f32 %v2321_v13, %v957_v36  ;;  %v1318_v44 = vmax.f32 %v1254_v58, 0.0  ;;  %v672_v13 = vmul.f32 %v1944_v24, %v2307_v40  ;;  %v673_v40 = vmul.f32 %v1946_v26, %v2330_v22  ;;  %v2398_v22 = vpop.permute.xlu0 %594 }
 0x145   : > { %v1319_v16 = vmax.f32 %v1255_v52, 0.0  ;;  %v677_v58 = vmul.f32 %v1946_v26, %v2355_v62  ;;  %v678_v52 = vmul.f32 %v1944_v24, %v2355_v62 }
 0x146   : > { %v1320_v56 = vmax.f32 %v1256_v39, 0.0  ;;  %v960_v7 = vpop.f32.mrb[36].mxu0 }
 0x147   : > { %v961_v47 = vadd.f32 %v960_v7, %v669_v4  ;;  %v962_v0 = vpop.f32.mrb[37].mxu0  ;;  %v1366_v49 = vpack.c.bf16 %v1319_v16, %v1317_v5  ;;  %v1189_v62 = vpop.permute.xlu1 %1188 }
 0x148   : > { %v963_v57 = vadd.f32 %v962_v0, %v670_v41  ;;  %v964_v6 = vpop.f32.mrb[38].mxu0  ;;  %v1367_v34 = vpack.c.bf16 %v1320_v56, %v1318_v44  ;;  %v1184_v56 = vpop.permute.xlu0 %1183 }
 0x149   : > { %v1257_v38 = vadd.f32 %v2341_v59, %v961_v47  ;;  %v965_v1 = vadd.f32 %v964_v6, %v671_v27  ;;  %v966_v8 = vpop.f32.mrb[39].mxu0 }
 0x14a   : > { %v1258_v3 = vadd.f32 %v2341_v59, %v963_v57  ;;  %v967_v9 = vadd.f32 %v966_v8, %v672_v13  ;;  %1423 = vmatprep.subr.bf16.mxu1 %v1367_v34 }
 0x14b   : > { %v1259_v46 = vadd.f32 %v2348_v45, %v965_v1  ;;  %1424 = vmatpush1.bf16.msra.mxu1 %v1366_v49  ;;  %v1321_v14 = vmax.f32 %v1257_v38, 0.0  ;;  %v681_v1 = vmul.f32 %v1946_v26, %v2378_v43 }
 0x14c   : > { %v1260_v48 = vadd.f32 %v2348_v45, %v967_v9  ;;  %v1322_v18 = vmax.f32 %v1258_v3, 0.0  ;;  %v676_v45 = vmul.f32 %v1944_v24, %v2336_v32  ;;  %v605_v9 = vpop.permute.xlu0 %604 }
 0x14d   : > { %v1323_v55 = vmax.f32 %v1259_v46, 0.0 }
 0x14e   : > { %v1324_v53 = vmax.f32 %v1260_v48, 0.0  ;;  %v970_v59 = vpop.f32.mrb[40].mxu0 }
 0x14f   : > { %v971_v60 = vadd.f32 %v970_v59, %v673_v40  ;;  %v972_v23 = vpop.f32.mrb[41].mxu0  ;;  %v1368_v15 = vpack.c.bf16 %v1323_v55, %v1321_v14 }
 0x150   : > { %v973_v54 = vadd.f32 %v972_v23, %v674_v10  ;;  %v974_v30 = vpop.f32.mrb[42].mxu0  ;;  %v1369_v28 = vpack.c.bf16 %v1324_v53, %v1322_v18  ;;  %v610_v18 = vpop.permute.xlu1 %609 }
 0x151   : > { %v1261_v29 = vadd.f32 %v1164_v31, %v971_v60  ;;  %v975_v21 = vadd.f32 %v974_v30, %v675_v20  ;;  %v976_v61 = vpop.f32.mrb[43].mxu0  ;;  %v1194_v30 = vpop.permute.xlu0 %1193 }
 0x152   : > { %v1262_v37 = vadd.f32 %v1164_v31, %v973_v54  ;;  %v977_v51 = vadd.f32 %v976_v61, %v676_v45  ;;  %1425 = vmatprep.subr.bf16.mxu1 %v1369_v28  ;;  %v679_v31 = vmul.f32 %v1946_v26, %v2359_v17 }
 0x153   : > { %v1263_v33 = vadd.f32 %v1169_v11, %v975_v21  ;;  %1426 = vmatpush1.bf16.msra.mxu1 %v1368_v15  ;;  %v1325_v32 = vmax.f32 %v1261_v29, 0.0  ;;  %v685_v29 = vmul.f32 %v1946_v26, %v2398_v22 }
 0x154   : > { %v1264_v42 = vadd.f32 %v1169_v11, %v977_v51  ;;  %v1326_v39 = vmax.f32 %v1262_v37, 0.0  ;;  %v680_v11 = vmul.f32 %v1944_v24, %v2359_v17  ;;  %v682_v17 = vmul.f32 %v1944_v24, %v2378_v43  ;;  %v1199_v37 = vpop.permute.xlu1 %1198 }
 0x155   : > { %v1327_v36 = vmax.f32 %v1263_v33, 0.0 }
 0x156   : > { %v1328_v4 = vmax.f32 %v1264_v42, 0.0  ;;  %v980_v5 = vpop.f32.mrb[44].mxu0 }
 0x157   : > { %v981_v16 = vadd.f32 %v980_v5, %v677_v58  ;;  %v982_v41 = vpop.f32.mrb[45].mxu0  ;;  %v1370_v44 = vpack.c.bf16 %v1327_v36, %v1325_v32  ;;  %v687_v58 = vmul.f32 %v1946_v26, %v2400_v35 }
 0x158   : > { %v983_v7 = vadd.f32 %v982_v41, %v678_v52  ;;  %v984_v27 = vpop.f32.mrb[46].mxu0  ;;  %v1371_v47 = vpack.c.bf16 %v1328_v4, %v1326_v39  ;;  %v688_v39 = vmul.f32 %v1944_v24, %v2400_v35  ;;  %v690_v35 = vmul.f32 %v1944_v24, %v605_v9 }
 0x159   : > { %v1265_v0 = vadd.f32 %v1174_v12, %v981_v16  ;;  %v985_v49 = vadd.f32 %v984_v27, %v679_v31  ;;  %v986_v13 = vpop.f32.mrb[47].mxu0  ;;  %v620_v27 = vpop.permute.xlu1 %619 }
 0x15a   : > { %v1266_v57 = vadd.f32 %v1174_v12, %v983_v7  ;;  %v987_v6 = vadd.f32 %v986_v13, %v680_v11  ;;  %1427 = vmatprep.subr.bf16.mxu1 %v1371_v47  ;;  %v683_v12 = vmul.f32 %v1946_v26, %v2384_v50 }
 0x15b   : > { %v1267_v34 = vadd.f32 %v1179_v63, %v985_v49  ;;  %1428 = vmatpush1.bf16.msra.mxu1 %v1370_v44  ;;  %v1329_v8 = vmax.f32 %v1265_v0, 0.0  ;;  %v689_v0 = vmul.f32 %v1946_v26, %v605_v9 }
 0x15c   : > { %v1268_v38 = vadd.f32 %v1179_v63, %v987_v6  ;;  %v1330_v46 = vmax.f32 %v1266_v57, 0.0  ;;  %v684_v63 = vmul.f32 %v1944_v24, %v2384_v50  ;;  %v686_v50 = vmul.f32 %v1944_v24, %v2398_v22  ;;  %v615_v22 = vpop.permute.xlu0 %614 }
 0x15d   : > { %v1331_v3 = vmax.f32 %v1267_v34, 0.0  ;;  %v691_v34 = vmul.f32 %v1946_v26, %v610_v18 }
 0x15e   : > { %v1332_v48 = vmax.f32 %v1268_v38, 0.0  ;;  %v990_v40 = vpop.f32.mrb[48].mxu0 }
 0x15f   : > { %v991_v14 = vadd.f32 %v990_v40, %v681_v1  ;;  %v992_v55 = vpop.f32.mrb[49].mxu0  ;;  %v1372_v10 = vpack.c.bf16 %v1331_v3, %v1329_v8  ;;  %v692_v3 = vmul.f32 %v1944_v24, %v610_v18  ;;  %v694_v18 = vmul.f32 %v1944_v24, %v615_v22 }
 0x160   : > { %v993_v53 = vadd.f32 %v992_v55, %v682_v17  ;;  %v994_v59 = vpop.f32.mrb[50].mxu0  ;;  %v1373_v20 = vpack.c.bf16 %v1332_v48, %v1330_v46  ;;  %v1204_v17 = vpop.permute.xlu0 %1203 }
 0x161   : > { %v1269_v60 = vadd.f32 %v1184_v56, %v991_v14  ;;  %v995_v23 = vadd.f32 %v994_v59, %v683_v12  ;;  %v996_v43 = vpop.f32.mrb[51].mxu0 }
 0x162   : > { %v1270_v15 = vadd.f32 %v1184_v56, %v993_v53  ;;  %v997_v45 = vadd.f32 %v996_v43, %v684_v63  ;;  %1429 = vmatprep.subr.bf16.mxu1 %v1373_v20  ;;  %v693_v20 = vmul.f32 %v1946_v26, %v615_v22 }
 0x163   : > { %v1271_v54 = vadd.f32 %v1189_v62, %v995_v23  ;;  %1430 = vmatpush1.bf16.msra.mxu1 %v1372_v10  ;;  %v1333_v21 = vmax.f32 %v1269_v60, 0.0  ;;  %v1209_v10 = vpop.permute.xlu1 %1208 }
 0x164   : > { %v1272_v28 = vadd.f32 %v1189_v62, %v997_v45  ;;  %v1334_v51 = vmax.f32 %v1270_v15, 0.0 }
 0x165   : > { %v1335_v61 = vmax.f32 %v1271_v54, 0.0  ;;  %v695_v54 = vmul.f32 %v1946_v26, %v620_v27 }
 0x166   : > { %v1336_v33 = vmax.f32 %v1272_v28, 0.0  ;;  %v1000_v42 = vpop.f32.mrb[52].mxu0 }
 0x167   : > { %v1001_v32 = vadd.f32 %v1000_v42, %v685_v29  ;;  %v1002_v36 = vpop.f32.mrb[53].mxu0  ;;  %v1374_v52 = vpack.c.bf16 %v1335_v61, %v1333_v21  ;;  %v696_v21 = vmul.f32 %v1944_v24, %v620_v27  ;;  %v1214_v61 = vpop.permute.xlu0 %1213 }
 0x168   : > { %v1003_v4 = vadd.f32 %v1002_v36, %v686_v50  ;;  %v1004_v5 = vpop.f32.mrb[54].mxu0  ;;  %v1375_v31 = vpack.c.bf16 %v1336_v33, %v1334_v51 }
 0x169   : > { %v1273_v16 = vadd.f32 %v1194_v30, %v1001_v32  ;;  %v1005_v41 = vadd.f32 %v1004_v5, %v687_v58  ;;  %v1006_v44 = vpop.f32.mrb[55].mxu0  ;;  %v1219_v32 = vpop.permute.xlu1 %1218 }
 0x16a   : > { %v1274_v11 = vadd.f32 %v1194_v30, %v1003_v4  ;;  %v1007_v56 = vadd.f32 %v1006_v44, %v688_v39  ;;  %1431 = vmatprep.subr.bf16.mxu1 %v1375_v31  ;;  %v1397_v44 = vrot.slane %v2236_v19, %v2241_v25 }
 0x16b   : > { %v1275_v7 = vadd.f32 %v1199_v37, %v1005_v41  ;;  %1432 = vmatpush1.bf16.msra.mxu1 %v1374_v52  ;;  %v1337_v49 = vmax.f32 %v1273_v16, 0.0 }
 0x16c   : > { %v1276_v47 = vadd.f32 %v1199_v37, %v1007_v56  ;;  %v1338_v62 = vmax.f32 %v1274_v11, 0.0 }
 0x16d   : > { %v1339_v13 = vmax.f32 %v1275_v7, 0.0 }
 0x16e   : > { %v1340_v57 = vmax.f32 %v1276_v47, 0.0  ;;  %v1010_v6 = vpop.f32.mrb[56].mxu0 }
 0x16f   : > { %v1011_v38 = vadd.f32 %v1010_v6, %v689_v0  ;;  %v1012_v1 = vpop.f32.mrb[57].mxu0  ;;  %v1376_v8 = vpack.c.bf16 %v1339_v13, %v1337_v49 }
 0x170   : > { %v1013_v46 = vadd.f32 %v1012_v1, %v690_v35  ;;  %v1014_v48 = vpop.f32.mrb[58].mxu0  ;;  %v1377_v40 = vpack.c.bf16 %v1340_v57, %v1338_v62 }
 0x171   : > { %v1277_v12 = vadd.f32 %v1204_v17, %v1011_v38  ;;  %v1015_v14 = vadd.f32 %v1014_v48, %v691_v34  ;;  %v1016_v55 = vpop.f32.mrb[59].mxu0 }
 0x172   : > { %v1278_v63 = vadd.f32 %v1204_v17, %v1013_v46  ;;  %v1017_v9 = vadd.f32 %v1016_v55, %v692_v3  ;;  %1433 = vmatprep.subr.bf16.mxu1 %v1377_v40 }
 0x173   : > { %v1279_v53 = vadd.f32 %v1209_v10, %v1015_v14  ;;  %1434 = vmatpush1.bf16.msra.mxu1 %v1376_v8  ;;  %v1341_v60 = vmax.f32 %v1277_v12, 0.0 }
 0x174   : > { %v1280_v59 = vadd.f32 %v1209_v10, %v1017_v9  ;;  %v1342_v43 = vmax.f32 %v1278_v63, 0.0 }
 0x175   : > { %v1343_v23 = vmax.f32 %v1279_v53, 0.0 }
 0x176   : > { %v1344_v15 = vmax.f32 %v1280_v59, 0.0  ;;  %v1020_v45 = vpop.f32.mrb[60].mxu0 }
 0x177   : > { %v1021_v30 = vadd.f32 %v1020_v45, %v693_v20  ;;  %v1022_v28 = vpop.f32.mrb[61].mxu0  ;;  %v1378_v29 = vpack.c.bf16 %v1343_v23, %v1341_v60 }
 0x178   : > { %v1023_v50 = vadd.f32 %v1022_v28, %v694_v18  ;;  %v1024_v37 = vpop.f32.mrb[62].mxu0  ;;  %v1379_v51 = vpack.c.bf16 %v1344_v15, %v1342_v43 }
 0x179   : > { %v1281_v33 = vadd.f32 %v1214_v61, %v1021_v30  ;;  %v1025_v42 = vadd.f32 %v1024_v37, %v695_v54  ;;  %v1026_v58 = vpop.f32.mrb[63].mxu0 }
 0x17a   : > { %v1282_v36 = vadd.f32 %v1214_v61, %v1023_v50  ;;  %v1027_v52 = vadd.f32 %v1026_v58, %v696_v21  ;;  %1435 = vmatprep.subr.bf16.mxu1 %v1379_v51 }
 0x17b   : > { %v1283_v39 = vadd.f32 %v1219_v32, %v1025_v42  ;;  %1436 = vmatpush1.bf16.msra.mxu1 %v1378_v29  ;;  %v1345_v4 = vmax.f32 %v1281_v33, 0.0 }
 0x17c   : > { %v1284_v26 = vadd.f32 %v1219_v32, %v1027_v52  ;;  %v1346_v31 = vmax.f32 %v1282_v36, 0.0 }
 0x17d   : > { %v1347_v5 = vmax.f32 %v1283_v39, 0.0 }
 0x17e   : > { %v1348_v24 = vmax.f32 %v1284_v26, 0.0 }
 0x17f   : > { %v1380_v16 = vpack.c.bf16 %v1347_v5, %v1345_v4 }
 0x180   : > { %v1381_v41 = vpack.c.bf16 %v1348_v24, %v1346_v31 }
 0x182   : > { %1437 = vmatprep.subr.bf16.mxu1 %v1381_v41 }
 0x183   : > { %1438 = vmatpush1.bf16.msra.mxu1 %v1380_v16 }
 0x186   : > { %1440 = vmatmul.mubr.bf16.vlgmr.msra.gmra.mrb[0].mxu1 %v1397_v44 }
 0x259   : > { %v1441_v22 = vpop.f32.mrb[0].mxu1 }
 0x25a   : > { %v1443_v11 = vpop.f32.mrb[1].mxu1 }
 0x25b   : > { %v1450_v56 = vcombine.low %v1441_v22, %v1443_v11  ;;  %v1445_v7 = vpop.f32.mrb[2].mxu1 }
 0x25c   : > { %v1446_v27 = vpop.f32.mrb[3].mxu1 }
 0x25d   : > { %v1457_v47 = vrot.slane %v1450_v56, %v2241_v25 }
 0x25f   : > { %v1464_v0 = vrot.slane %v1457_v47, %v2241_v25 }
 0x261   : > { %1470 = vst.msk [vmem:[%s344_s10] sm:$0x3] %vm1468_vm3, %v1464_v0 }
 0x262   : > { %1734 = shalt.err (!%p1731_p5)
}
 0x263   : > { %s1735_s19 = scalar_lea.hbm %s2444_s12, 32  ;;  %s1739_s21 = scalar_lea.hbm %s2498_s7, 64 }
 0x264   : > { %p1736_p6 = scmp.ne.s32.totalorder %s2444_s12, %s1735_s19  ;;  %p1740_p10 = scmp.lt.u32.totalorder %s2444_s12, %s2498_s7 }
 0x265   : > { %p1741_p11 = scmp.lt.u32.totalorder %s1739_s21, %s1735_s19  ;;  %p1743_p13 = scmp.lt.u32.totalorder %s1735_s19, %s2444_s12 }
 0x266   : > { %p1737_p7 = pnand %p1736_p6, %p1885_p4 }
 0x267   : > { %p1742_p12 = por %p1741_p11, %p1740_p10 }
 0x268   : > { %p1738_p9 = pneg %p1737_p7 }
 0x269   : > { %p1744_p0 = por %p1743_p13, %p1742_p12 }
 0x26b   : > { %p1745_p1 = pnand %p1744_p0, %p1738_p9 }
 0x26d   : > { %1748 = shalt.err (!%p1745_p1)
}
 0x26e   : > { %1644 = dma.vmem_to_hbm [thread:$0]  (%p1885_p4), %s2446_s9, 32, %s2444_s12, %s1472_s27  }
 0x26f PF: > { %p1650_p2 = scmp.ge.s32.totalorder %s1799_s29, 2  ;;  %s1500_s30 = sand.u32 1, %s1779_s24  }
 0x270   : > { %s1501_s8 = scalar_lea.sflag [#allocation3], %s1500_s30 }
 0x271   : > { %p1647_p3 = pnand %p1650_p2, %p1892_p8 }
 0x273   : > { %1774 = dma.done.wait (!%p1647_p3), %s1501_s8, 32  }
 0x274   : > { %1776 = vsyncadd (!%p1647_p3), %s1501_s8, 4294967264  ;;  %s20_s29 = sadd.s32 1, %s1799_s29   ;;  %s2503_s11 = sld [smem:[#allocation5_spill]] }
 0x275   : > { %p17_p5 = scmp.ge.s32.totalorder %s20_s29, 4   ;;  %s2504_s24 = smov %s1783_s25 }
 0x276   : > { %s2505_s25 = smov %s1787_s26  ;;  %s2506_s26 = smov %s1898_s14 }
 0x277   : > { %s2507_s27 = smov %s1795_s28  ;;  %19 = sbr.rel (!%p17_p5) target bundleno = 4 (0x4), region = 89 }
 0x27a   : > { %s2508_s28 = smov %s2503_s11 }
 0x27e   :  { %1506 = vsyncpa [#allocation3], 1 }
 0x27f   :  { %1508 = vsyncpa [#allocation3 + $0x1], 1 }

</bundles_post_ra>
